<compile_context>
chip_gen: v7x
topology: tpu7x:2x2x1
jax: 0.10.0
libtpu: 0.0.40
codegen_flags: <defaults>
</compile_context>

<pallas_src>
import jax
import jax.numpy as jnp
from jax import lax
from jax.experimental import pallas as pl
from jax.experimental.pallas import tpu as pltpu

# ---------------------------------------------------------------- config ----
C0, C1, C2 = 16, 8, 4          # channels_list = [16, 8, 4]
C_OUT = 2                      # decoder out_channels
L0, L1, L2 = 8, 16, 32         # line length at each scale (coarse -> fine)
LINES_PER_GROUP = 8            # 8 lines x 16 positions = 128 lanes per step
LANES = LINES_PER_GROUP * L1   # 128 -> exactly one vreg lane-width
EPS = 1e-5                     # BatchNorm1d eps

# packed-parameter row layout (all offsets are multiples of 8)
R_UP0 = 0                      # 2 x (C1, C0): ConvT(16->8) taps k=0, k=1
R_C0 = R_UP0 + 2 * C1          # 6 x (C1, C1): stage-0 k=3 conv (up / skip)
R_UP1 = R_C0 + 6 * C1          # 1 x (C1, C1): ConvT(8->4), plane-packed
R_C1 = R_UP1 + C1              # 6 x (C1, C1): stage-1 k=3 conv, plane-packed
R_OUT = R_C1 + 6 * C1          # 1 x (C1, C1): Conv1d(4->2, k=1), plane-packed
R_SH_UP0 = R_OUT + C1          # per-channel shifts, one per row, in lane 0
R_SH_C0 = R_SH_UP0 + C1
R_SH_UP1 = R_SH_C0 + C1
R_SH_C1 = R_SH_UP1 + C1
R_SH_OUT = R_SH_C1 + C1
W_ROWS = R_SH_OUT + C1         # 168
W_COLS = C0                    # 16


# ---------------------------------------------------------------- kernel ----
def _decoder_kernel(x2_ref, s1_ref, s2_ref, w_ref, o_ref):
    # One (1, 128) iota drives every mask (no full (C,128) iota vregs).
    lane = lax.broadcasted_iota(jnp.int32, (1, LANES), 1)
    pos = lane & (L1 - 1)            # position inside a 16-lane (sub)line
    not_first = pos != 0
    not_last = pos != L1 - 1
    even = (lane & 1) == 0           # interleaved-position parity (stage 0)

    # NOTE: on v6e/v7x the dot operands could be cast to bf16 at the matmul
    # boundary; kept f32 here (tiny problem, exactness preferred).
    def mm(r0, co, ci, h):           # (co, ci) @ (ci, LANES) on the MXU
        return jnp.dot(w_ref[r0:r0 + co, 0:ci], h,
                       preferred_element_type=jnp.float32)

    def shift(r0):                   # per-channel shift as a (C1, 1) column
        return w_ref[r0:r0 + C1, 0:1]

    def conv3(h, r0):
        # k=3 'same' Conv1d along lanes (each line = 16 consecutive lanes):
        # three accumulating MXU dots; neighbour taps are XLU lane rolls with
        # the line boundaries zeroed (no im2col concat is materialised).
        h_l = jnp.where(not_first, pltpu.roll(h, shift=1, axis=1), 0.0)
        h_r = jnp.where(not_last, pltpu.roll(h, shift=LANES - 1, axis=1), 0.0)
        return (mm(r0, C1, C1, h_l) + mm(r0 + C1, C1, C1, h)
                + mm(r0 + 2 * C1, C1, C1, h_r))

    # stage 0 upsample: ConvTranspose1d(16->8, k=2, s=2) + BN + ReLU.  The
    # input is pre-repeated 2x along lanes; lane parity picks the k=0/k=1 tap.
    x2 = x2_ref[0]
    up0 = jnp.where(even, mm(R_UP0, C1, C0, x2), mm(R_UP0 + C1, C1, C0, x2))
    up0 = jnp.maximum(up0 + shift(R_SH_UP0), 0.0)

    # stage 0 ConvBlock1d: Conv1d(16->8,k=3)+BN+ReLU on concat[up0, skip1];
    # the channel concat is folded into two 8-channel convs that are summed.
    h0 = conv3(up0, R_C0) + conv3(s1_ref[0], R_C0 + 3 * C1)
    h0 = jnp.maximum(h0 + shift(R_SH_C0), 0.0)

    # stage 1 upsample: ConvTranspose1d(8->4)+BN+ReLU, output plane-packed
    # (sublanes 0:4 = even output positions, 4:8 = odd) -> no lane interleave.
    up1 = jnp.maximum(mm(R_UP1, C1, C1, h0) + shift(R_SH_UP1), 0.0)

    # stage 1 ConvBlock1d: Conv1d(8->4,k=3)+BN+ReLU on concat[up1, skip2],
    # expressed in plane-packed form via block weight matrices (pack_params).
    h1 = conv3(up1, R_C1) + conv3(s2_ref[0], R_C1 + 3 * C1)
    h1 = jnp.maximum(h1 + shift(R_SH_C1), 0.0)

    # output Conv1d(4->2, k=1), plane-packed block-diagonal weight; rows 4:8 of
    # the padded weight/shift are zero, so this is one full (8,128) store.
    o_ref[0] = mm(R_OUT, C1, C1, h1) + shift(R_SH_OUT)


# ------------------------------------------------------- parameter packing --
def pack_params(params):
    """Fold eval-mode BatchNorm into conv weights/biases and pack every weight
    matrix + per-channel shift of the whole decoder into a single (168, 16)
    array.  Param-only: run ONCE, outside the per-call path."""
    st0, st1 = params['stages']
    w = jnp.zeros((W_ROWS, W_COLS), jnp.float32)

    def put(w, r0, mat):
        co, ci = mat.shape
        return w.at[r0:r0 + co, 0:ci].set(mat)

    def put_col(w, r0, vec):
        return w.at[r0:r0 + vec.shape[0], 0].set(vec)

    def fold(bn, conv_bias):
        # TODO(synk): BatchNorm1d folded in eval mode (running stats);
        # training-mode batch statistics would need a cross-line reduction.
        scale = bn['w'] / jnp.sqrt(bn['v'] + EPS)
        return scale, bn['b'] + (conv_bias - bn['m']) * scale

    # stage 0 upsample (ConvTranspose1d weight layout: (Cin, Cout, k))
    sc, sh = fold(st0['up_bn'], st0['up_b'])
    w = put(w, R_UP0, sc[:, None] * st0['up_w'][:, :, 0].T)
    w = put(w, R_UP0 + C1, sc[:, None] * st0['up_w'][:, :, 1].T)
    w = put_col(w, R_SH_UP0, sh)

    # stage 0 conv block (Conv1d weight layout: (Cout, Cin, k));
    # channel-concat [up0, skip1] split into two 8-channel convs.
    sc, sh = fold(st0['c_bn'], st0['c_b'])
    for t in range(3):
        wt = sc[:, None] * st0['c_w'][:, :, t]            # (8, 16)
        w = put(w, R_C0 + t * C1, wt[:, :C1])             # acts on up0
        w = put(w, R_C0 + (3 + t) * C1, wt[:, C1:])       # acts on skip1
    w = put_col(w, R_SH_C0, sh)

    # stage 1 upsample, plane-packed: rows 0:4 -> even positions (k=0 tap),
    # rows 4:8 -> odd positions (k=1 tap).
    sc, sh = fold(st1['up_bn'], st1['up_b'])
    w = put(w, R_UP1, jnp.concatenate(
        [sc[:, None] * st1['up_w'][:, :, 0].T,
         sc[:, None] * st1['up_w'][:, :, 1].T], axis=0))
    w = put_col(w, R_SH_UP1, jnp.concatenate([sh, sh]))

    # stage 1 conv block, plane-packed.  For a length-32 line stored as
    # even/odd planes E/O (16 lanes each):
    #   out_E[m] = WL O[m-1] + WC E[m] + WR O[m]
    #   out_O[m] = WL E[m]   + WC O[m] + WR E[m+1]
    # which is exactly conv3() applied with the 8x8 block matrices below.
    sc, sh = fold(st1['c_bn'], st1['c_b'])
    taps = [sc[:, None] * st1['c_w'][:, :, t] for t in range(3)]   # (4, 8)
    z = jnp.zeros((C2, C2), jnp.float32)
    for s_idx, cols in enumerate((slice(0, C2), slice(C2, C1))):
        tl, tc, tr = (t[:, cols] for t in taps)                    # (4, 4)
        r0 = R_C1 + s_idx * 3 * C1
        w = put(w, r0, jnp.block([[z, tl], [z, z]]))           # x[p-1] term
        w = put(w, r0 + C1, jnp.block([[tc, tr], [tl, tc]]))   # x[p]   term
        w = put(w, r0 + 2 * C1, jnp.block([[z, z], [tr, z]]))  # x[p+1] term
    w = put_col(w, R_SH_C1, jnp.concatenate([sh, sh]))

    # output Conv1d(4->2, k=1), plane-packed block diagonal, padded to 8 rows
    ow = params['out_w'][:, :, 0]                              # (2, 4)
    wo = jnp.zeros((C1, C1), jnp.float32)
    wo = wo.at[0:C_OUT, 0:C2].set(ow).at[C_OUT:2 * C_OUT, C2:C1].set(ow)
    w = put(w, R_OUT, wo)
    bo = jnp.zeros((C1,), jnp.float32)
    bo = bo.at[0:C_OUT].set(params['out_b'])
    bo = bo.at[C_OUT:2 * C_OUT].set(params['out_b'])
    w = put_col(w, R_SH_OUT, bo)
    return w


# --------------------------------------------------------------- forward ----
def decoder_forward(x, skip1, skip2, wpack):
    """x: [N,16,8]; skip1 (=intermediate_states[-1]): [N,8,16];
    skip2 (=intermediate_states[-2]): [N,4,32]  ->  [N,2,32]."""
    n = x.shape[0]
    assert n % LINES_PER_GROUP == 0
    g = n // LINES_PER_GROUP

    # lane-dense layout prep (tiny data-dependent reshapes; params untouched)
    xg = jnp.transpose(x.reshape(g, LINES_PER_GROUP, C0, L0), (0, 2, 1, 3))
    x2 = jnp.repeat(xg.reshape(g, C0, LINES_PER_GROUP * L0), 2, axis=2)
    s1 = jnp.transpose(skip1.reshape(g, LINES_PER_GROUP, C1, L1),
                       (0, 2, 1, 3)).reshape(g, C1, LANES)
    s2 = jnp.transpose(skip2.reshape(g, LINES_PER_GROUP, C2, L1, 2),
                       (0, 4, 2, 1, 3)).reshape(g, 2 * C2, LANES)

    out = pl.pallas_call(
        _decoder_kernel,
        out_shape=jax.ShapeDtypeStruct((g, C1, LANES), jnp.float32),
        grid=(g,),
        in_specs=[
            pl.BlockSpec((1, C0, LANES), lambda i: (i, 0, 0)),
            pl.BlockSpec((1, C1, LANES), lambda i: (i, 0, 0)),
            pl.BlockSpec((1, 2 * C2, LANES), lambda i: (i, 0, 0)),
            pl.BlockSpec((W_ROWS, W_COLS), lambda i: (0, 0)),
        ],
        out_specs=pl.BlockSpec((1, C1, LANES), lambda i: (i, 0, 0)),
        compiler_params=pltpu.CompilerParams(
            dimension_semantics=("parallel",)),
    )(x2, s1, s2, wpack)

    # un-pack the even/odd position planes back to [N, C, L]
    o = out[:, :2 * C_OUT, :].reshape(g, 2, C_OUT, LINES_PER_GROUP, L1)
    return jnp.transpose(o, (0, 3, 2, 4, 1)).reshape(n, C_OUT, L2)


# ------------------------------------------------------------- reference ----
def ref_decoder(x, skip1, skip2, params):
    """Pure-JAX reference mirroring UNetDecoder1d.forward (eval-mode BN)."""
    hp = lax.Precision.HIGHEST

    def bn(h, p):
        return ((h - p['m'][None, :, None])
                / jnp.sqrt(p['v'][None, :, None] + EPS)
                * p['w'][None, :, None] + p['b'][None, :, None])

    def conv_t2(h, w, b):          # ConvTranspose1d(k=2, s=2), w: (Ci, Co, 2)
        y = jnp.einsum('ncl,cok->nolk', h, w, precision=hp)
        return y.reshape(y.shape[0], y.shape[1], -1) + b[None, :, None]

    def conv3(h, w, b):            # Conv1d(k=3, padding='same'), w: (Co, Ci, 3)
        y = lax.conv_general_dilated(h, w, (1,), ((1, 1),),
                                     dimension_numbers=('NCH', 'OIH', 'NCH'),
                                     precision=hp)
        return y + b[None, :, None]

    h = x
    for st, skip in zip(params['stages'], (skip1, skip2)):
        h = jax.nn.relu(bn(conv_t2(h, st['up_w'], st['up_b']), st['up_bn']))
        h = jnp.concatenate([h, skip], axis=1)
        h = jax.nn.relu(bn(conv3(h, st['c_w'], st['c_b']), st['c_bn']))
        h = jax.nn.relu(h)         # ConvBlock1d's trailing F.relu (no-op)
    y = jnp.einsum('ncl,oc->nol', h, params['out_w'][:, :, 0], precision=hp)
    return y + params['out_b'][None, :, None]


def make_params(key):
    ks = iter(jax.random.split(key, 32))

    def nrm(shape, s):
        return s * jax.random.normal(next(ks), shape, jnp.float32)

    def bn(c):
        return {'w': 1.0 + nrm((c,), 0.1), 'b': nrm((c,), 0.1),
                'm': nrm((c,), 0.1),
                'v': jax.random.uniform(next(ks), (c,), jnp.float32, 0.5, 1.5)}

    def stage(ci, co):
        return {'up_w': nrm((ci, co, 2), 0.3), 'up_b': nrm((co,), 0.1),
                'up_bn': bn(co),
                'c_w': nrm((co, ci, 3), 0.3), 'c_b': nrm((co,), 0.1),
                'c_bn': bn(co)}

    return {'stages': [stage(C0, C1), stage(C1, C2)],
            'out_w': nrm((C_OUT, C2, 1), 0.3), 'out_b': nrm((C_OUT,), 0.1)}


if __name__ == "__main__":
    key = jax.random.PRNGKey(0)
    kx, k1, k2, kp = jax.random.split(key, 4)
    n = 2 * LINES_PER_GROUP                                    # 16 lines
    x = jax.random.normal(kx, (n, C0, L0), jnp.float32)        # decoder input
    skip1 = jax.random.normal(k1, (n, C1, L1), jnp.float32)    # enc. state -1
    skip2 = jax.random.normal(k2, (n, C2, L2), jnp.float32)    # enc. state -2
    params = make_params(kp)

    wpack = pack_params(params)      # param-only folding/packing: done ONCE
    fwd = jax.jit(decoder_forward)
    out = jax.block_until_ready(fwd(x, skip1, skip2, wpack))

    ref = ref_decoder(x, skip1, skip2, params)
    assert out.shape == (n, C_OUT, L2)
    if not jnp.allclose(out, ref, atol=1e-3, rtol=1e-3):
        raise AssertionError(
            "Pallas kernel does not match reference "
            f"(max abs err {jnp.max(jnp.abs(out - ref)):.2e})")
    print("KERNEL_OK")
</pallas_src>

<mosaic_0001>
module attributes {stable_mosaic.version = 11 : i64} {
  func.func @_decoder_kernel(%arg0: i32, %arg1: memref<1x16x128xf32, #tpu.memory_space<vmem>>, %arg2: memref<1x8x128xf32, #tpu.memory_space<vmem>>, %arg3: memref<1x8x128xf32, #tpu.memory_space<vmem>>, %arg4: memref<168x16xf32, #tpu.memory_space<vmem>>, %arg5: memref<1x8x128xf32, #tpu.memory_space<vmem>>) attributes {dimension_semantics = [#tpu.dimension_semantics<parallel>], iteration_bounds = array<i64: 2>, scalar_prefetch = 0 : i64, scratch_operands = 0 : i64, tpu.core_type = #tpu.core_type<tc>, window_params = [{transform_indices = @transform_0, window_bounds = array<i64: 1, 16, 128>}, {transform_indices = @transform_1, window_bounds = array<i64: 1, 8, 128>}, {transform_indices = @transform_2, window_bounds = array<i64: 1, 8, 128>}, {pipeline_mode = #tpu.pipeline_mode<synchronous>, transform_indices = @transform_3, window_bounds = array<i64: 168, 16>}, {transform_indices = @transform_4, window_bounds = array<i64: 1, 8, 128>}]} {
    %0 = tpu.iota {dimensions = array<i32: 1>} : vector<1x128xi32>
    %c15_i32 = arith.constant 15 : i32
    %1 = vector.broadcast %c15_i32 : i32 to vector<1x128xi32>
    %2 = arith.andi %0, %1 : vector<1x128xi32>
    %c0_i32 = arith.constant 0 : i32
    %3 = vector.broadcast %c0_i32 : i32 to vector<1x128xi32>
    %4 = arith.cmpi ne, %2, %3 : vector<1x128xi32>
    %c15_i32_0 = arith.constant 15 : i32
    %5 = vector.broadcast %c15_i32_0 : i32 to vector<1x128xi32>
    %6 = arith.cmpi ne, %2, %5 : vector<1x128xi32>
    %c1_i32 = arith.constant 1 : i32
    %7 = vector.broadcast %c1_i32 : i32 to vector<1x128xi32>
    %8 = arith.andi %0, %7 : vector<1x128xi32>
    %c0_i32_1 = arith.constant 0 : i32
    %9 = vector.broadcast %c0_i32_1 : i32 to vector<1x128xi32>
    %10 = arith.cmpi eq, %8, %9 : vector<1x128xi32>
    %c0 = arith.constant 0 : index
    %c0_2 = arith.constant 0 : index
    %c0_3 = arith.constant 0 : index
    %11 = vector.load %arg1[%c0, %c0_2, %c0_3] : memref<1x16x128xf32, #tpu.memory_space<vmem>>, vector<1x16x128xf32>
    %12 = vector.shape_cast %11 : vector<1x16x128xf32> to vector<16x128xf32>
    %c0_4 = arith.constant 0 : index
    %c0_5 = arith.constant 0 : index
    %13 = vector.load %arg4[%c0_4, %c0_5] : memref<168x16xf32, #tpu.memory_space<vmem>>, vector<8x16xf32>
    %cst = arith.constant dense<0.000000e+00> : vector<8x128xf32>
    %14 = tpu.matmul %13, %12, %cst {dimension_numbers = #tpu.dot_dimension_numbers<[1], [0], [0], [1], [0, 0, 1, 1], [], []>} : vector<8x16xf32>, vector<16x128xf32>, vector<8x128xf32> -> vector<8x128xf32>
    %c8 = arith.constant 8 : index
    %c0_6 = arith.constant 0 : index
    %15 = vector.load %arg4[%c8, %c0_6] : memref<168x16xf32, #tpu.memory_space<vmem>>, vector<8x16xf32>
    %cst_7 = arith.constant dense<0.000000e+00> : vector<8x128xf32>
    %16 = tpu.matmul %15, %12, %cst_7 {dimension_numbers = #tpu.dot_dimension_numbers<[1], [0], [0], [1], [0, 0, 1, 1], [], []>} : vector<8x16xf32>, vector<16x128xf32>, vector<8x128xf32> -> vector<8x128xf32>
    %17 = vector.shape_cast %10 : vector<1x128xi1> to vector<1x128xi1>
    %18 = vector.broadcast %17 : vector<1x128xi1> to vector<8x128xi1>
    %19 = arith.select %18, %14, %16 : vector<8x128xi1>, vector<8x128xf32>
    %c128 = arith.constant 128 : index
    %c0_8 = arith.constant 0 : index
    %20 = vector.load %arg4[%c128, %c0_8] : memref<168x16xf32, #tpu.memory_space<vmem>>, vector<8x1xf32>
    %21 = vector.broadcast %20 : vector<8x1xf32> to vector<8x128xf32>
    %22 = arith.addf %19, %21 : vector<8x128xf32>
    %cst_9 = arith.constant 0.000000e+00 : f32
    %23 = vector.broadcast %cst_9 : f32 to vector<8x128xf32>
    %24 = arith.maximumf %22, %23 : vector<8x128xf32>
    %c1_i32_10 = arith.constant 1 : i32
    %25 = tpu.dynamic_rotate %24 by %c1_i32_10 dim 1 : vector<8x128xf32>, i32 -> vector<8x128xf32>
    %cst_11 = arith.constant 0.000000e+00 : f32
    %26 = vector.shape_cast %4 : vector<1x128xi1> to vector<1x128xi1>
    %27 = vector.broadcast %26 : vector<1x128xi1> to vector<8x128xi1>
    %28 = vector.broadcast %cst_11 : f32 to vector<8x128xf32>
    %29 = arith.select %27, %25, %28 : vector<8x128xi1>, vector<8x128xf32>
    %c127_i32 = arith.constant 127 : i32
    %30 = tpu.dynamic_rotate %24 by %c127_i32 dim 1 : vector<8x128xf32>, i32 -> vector<8x128xf32>
    %cst_12 = arith.constant 0.000000e+00 : f32
    %31 = vector.shape_cast %6 : vector<1x128xi1> to vector<1x128xi1>
    %32 = vector.broadcast %31 : vector<1x128xi1> to vector<8x128xi1>
    %33 = vector.broadcast %cst_12 : f32 to vector<8x128xf32>
    %34 = arith.select %32, %30, %33 : vector<8x128xi1>, vector<8x128xf32>
    %c16 = arith.constant 16 : index
    %c0_13 = arith.constant 0 : index
    %35 = vector.load %arg4[%c16, %c0_13] : memref<168x16xf32, #tpu.memory_space<vmem>>, vector<8x8xf32>
    %cst_14 = arith.constant dense<0.000000e+00> : vector<8x128xf32>
    %36 = tpu.matmul %35, %29, %cst_14 {dimension_numbers = #tpu.dot_dimension_numbers<[1], [0], [0], [1], [0, 0, 1, 1], [], []>} : vector<8x8xf32>, vector<8x128xf32>, vector<8x128xf32> -> vector<8x128xf32>
    %c24 = arith.constant 24 : index
    %c0_15 = arith.constant 0 : index
    %37 = vector.load %arg4[%c24, %c0_15] : memref<168x16xf32, #tpu.memory_space<vmem>>, vector<8x8xf32>
    %cst_16 = arith.constant dense<0.000000e+00> : vector<8x128xf32>
    %38 = tpu.matmul %37, %24, %cst_16 {dimension_numbers = #tpu.dot_dimension_numbers<[1], [0], [0], [1], [0, 0, 1, 1], [], []>} : vector<8x8xf32>, vector<8x128xf32>, vector<8x128xf32> -> vector<8x128xf32>
    %39 = arith.addf %36, %38 : vector<8x128xf32>
    %c32 = arith.constant 32 : index
    %c0_17 = arith.constant 0 : index
    %40 = vector.load %arg4[%c32, %c0_17] : memref<168x16xf32, #tpu.memory_space<vmem>>, vector<8x8xf32>
    %cst_18 = arith.constant dense<0.000000e+00> : vector<8x128xf32>
    %41 = tpu.matmul %40, %34, %cst_18 {dimension_numbers = #tpu.dot_dimension_numbers<[1], [0], [0], [1], [0, 0, 1, 1], [], []>} : vector<8x8xf32>, vector<8x128xf32>, vector<8x128xf32> -> vector<8x128xf32>
    %42 = arith.addf %39, %41 : vector<8x128xf32>
    %c0_19 = arith.constant 0 : index
    %c0_20 = arith.constant 0 : index
    %c0_21 = arith.constant 0 : index
    %43 = vector.load %arg2[%c0_19, %c0_20, %c0_21] : memref<1x8x128xf32, #tpu.memory_space<vmem>>, vector<1x8x128xf32>
    %44 = vector.shape_cast %43 : vector<1x8x128xf32> to vector<8x128xf32>
    %c1_i32_22 = arith.constant 1 : i32
    %45 = tpu.dynamic_rotate %44 by %c1_i32_22 dim 1 : vector<8x128xf32>, i32 -> vector<8x128xf32>
    %cst_23 = arith.constant 0.000000e+00 : f32
    %46 = vector.shape_cast %4 : vector<1x128xi1> to vector<1x128xi1>
    %47 = vector.broadcast %46 : vector<1x128xi1> to vector<8x128xi1>
    %48 = vector.broadcast %cst_23 : f32 to vector<8x128xf32>
    %49 = arith.select %47, %45, %48 : vector<8x128xi1>, vector<8x128xf32>
    %c127_i32_24 = arith.constant 127 : i32
    %50 = tpu.dynamic_rotate %44 by %c127_i32_24 dim 1 : vector<8x128xf32>, i32 -> vector<8x128xf32>
    %cst_25 = arith.constant 0.000000e+00 : f32
    %51 = vector.shape_cast %6 : vector<1x128xi1> to vector<1x128xi1>
    %52 = vector.broadcast %51 : vector<1x128xi1> to vector<8x128xi1>
    %53 = vector.broadcast %cst_25 : f32 to vector<8x128xf32>
    %54 = arith.select %52, %50, %53 : vector<8x128xi1>, vector<8x128xf32>
    %c40 = arith.constant 40 : index
    %c0_26 = arith.constant 0 : index
    %55 = vector.load %arg4[%c40, %c0_26] : memref<168x16xf32, #tpu.memory_space<vmem>>, vector<8x8xf32>
    %cst_27 = arith.constant dense<0.000000e+00> : vector<8x128xf32>
    %56 = tpu.matmul %55, %49, %cst_27 {dimension_numbers = #tpu.dot_dimension_numbers<[1], [0], [0], [1], [0, 0, 1, 1], [], []>} : vector<8x8xf32>, vector<8x128xf32>, vector<8x128xf32> -> vector<8x128xf32>
    %c48 = arith.constant 48 : index
    %c0_28 = arith.constant 0 : index
    %57 = vector.load %arg4[%c48, %c0_28] : memref<168x16xf32, #tpu.memory_space<vmem>>, vector<8x8xf32>
    %cst_29 = arith.constant dense<0.000000e+00> : vector<8x128xf32>
    %58 = tpu.matmul %57, %44, %cst_29 {dimension_numbers = #tpu.dot_dimension_numbers<[1], [0], [0], [1], [0, 0, 1, 1], [], []>} : vector<8x8xf32>, vector<8x128xf32>, vector<8x128xf32> -> vector<8x128xf32>
    %59 = arith.addf %56, %58 : vector<8x128xf32>
    %c56 = arith.constant 56 : index
    %c0_30 = arith.constant 0 : index
    %60 = vector.load %arg4[%c56, %c0_30] : memref<168x16xf32, #tpu.memory_space<vmem>>, vector<8x8xf32>
    %cst_31 = arith.constant dense<0.000000e+00> : vector<8x128xf32>
    %61 = tpu.matmul %60, %54, %cst_31 {dimension_numbers = #tpu.dot_dimension_numbers<[1], [0], [0], [1], [0, 0, 1, 1], [], []>} : vector<8x8xf32>, vector<8x128xf32>, vector<8x128xf32> -> vector<8x128xf32>
    %62 = arith.addf %59, %61 : vector<8x128xf32>
    %63 = arith.addf %42, %62 : vector<8x128xf32>
    %c136 = arith.constant 136 : index
    %c0_32 = arith.constant 0 : index
    %64 = vector.load %arg4[%c136, %c0_32] : memref<168x16xf32, #tpu.memory_space<vmem>>, vector<8x1xf32>
    %65 = vector.broadcast %64 : vector<8x1xf32> to vector<8x128xf32>
    %66 = arith.addf %63, %65 : vector<8x128xf32>
    %cst_33 = arith.constant 0.000000e+00 : f32
    %67 = vector.broadcast %cst_33 : f32 to vector<8x128xf32>
    %68 = arith.maximumf %66, %67 : vector<8x128xf32>
    %c64 = arith.constant 64 : index
    %c0_34 = arith.constant 0 : index
    %69 = vector.load %arg4[%c64, %c0_34] : memref<168x16xf32, #tpu.memory_space<vmem>>, vector<8x8xf32>
    %cst_35 = arith.constant dense<0.000000e+00> : vector<8x128xf32>
    %70 = tpu.matmul %69, %68, %cst_35 {dimension_numbers = #tpu.dot_dimension_numbers<[1], [0], [0], [1], [0, 0, 1, 1], [], []>} : vector<8x8xf32>, vector<8x128xf32>, vector<8x128xf32> -> vector<8x128xf32>
    %c144 = arith.constant 144 : index
    %c0_36 = arith.constant 0 : index
    %71 = vector.load %arg4[%c144, %c0_36] : memref<168x16xf32, #tpu.memory_space<vmem>>, vector<8x1xf32>
    %72 = vector.broadcast %71 : vector<8x1xf32> to vector<8x128xf32>
    %73 = arith.addf %70, %72 : vector<8x128xf32>
    %cst_37 = arith.constant 0.000000e+00 : f32
    %74 = vector.broadcast %cst_37 : f32 to vector<8x128xf32>
    %75 = arith.maximumf %73, %74 : vector<8x128xf32>
    %c1_i32_38 = arith.constant 1 : i32
    %76 = tpu.dynamic_rotate %75 by %c1_i32_38 dim 1 : vector<8x128xf32>, i32 -> vector<8x128xf32>
    %cst_39 = arith.constant 0.000000e+00 : f32
    %77 = vector.shape_cast %4 : vector<1x128xi1> to vector<1x128xi1>
    %78 = vector.broadcast %77 : vector<1x128xi1> to vector<8x128xi1>
    %79 = vector.broadcast %cst_39 : f32 to vector<8x128xf32>
    %80 = arith.select %78, %76, %79 : vector<8x128xi1>, vector<8x128xf32>
    %c127_i32_40 = arith.constant 127 : i32
    %81 = tpu.dynamic_rotate %75 by %c127_i32_40 dim 1 : vector<8x128xf32>, i32 -> vector<8x128xf32>
    %cst_41 = arith.constant 0.000000e+00 : f32
    %82 = vector.shape_cast %6 : vector<1x128xi1> to vector<1x128xi1>
    %83 = vector.broadcast %82 : vector<1x128xi1> to vector<8x128xi1>
    %84 = vector.broadcast %cst_41 : f32 to vector<8x128xf32>
    %85 = arith.select %83, %81, %84 : vector<8x128xi1>, vector<8x128xf32>
    %c72 = arith.constant 72 : index
    %c0_42 = arith.constant 0 : index
    %86 = vector.load %arg4[%c72, %c0_42] : memref<168x16xf32, #tpu.memory_space<vmem>>, vector<8x8xf32>
    %cst_43 = arith.constant dense<0.000000e+00> : vector<8x128xf32>
    %87 = tpu.matmul %86, %80, %cst_43 {dimension_numbers = #tpu.dot_dimension_numbers<[1], [0], [0], [1], [0, 0, 1, 1], [], []>} : vector<8x8xf32>, vector<8x128xf32>, vector<8x128xf32> -> vector<8x128xf32>
    %c80 = arith.constant 80 : index
    %c0_44 = arith.constant 0 : index
    %88 = vector.load %arg4[%c80, %c0_44] : memref<168x16xf32, #tpu.memory_space<vmem>>, vector<8x8xf32>
    %cst_45 = arith.constant dense<0.000000e+00> : vector<8x128xf32>
    %89 = tpu.matmul %88, %75, %cst_45 {dimension_numbers = #tpu.dot_dimension_numbers<[1], [0], [0], [1], [0, 0, 1, 1], [], []>} : vector<8x8xf32>, vector<8x128xf32>, vector<8x128xf32> -> vector<8x128xf32>
    %90 = arith.addf %87, %89 : vector<8x128xf32>
    %c88 = arith.constant 88 : index
    %c0_46 = arith.constant 0 : index
    %91 = vector.load %arg4[%c88, %c0_46] : memref<168x16xf32, #tpu.memory_space<vmem>>, vector<8x8xf32>
    %cst_47 = arith.constant dense<0.000000e+00> : vector<8x128xf32>
    %92 = tpu.matmul %91, %85, %cst_47 {dimension_numbers = #tpu.dot_dimension_numbers<[1], [0], [0], [1], [0, 0, 1, 1], [], []>} : vector<8x8xf32>, vector<8x128xf32>, vector<8x128xf32> -> vector<8x128xf32>
    %93 = arith.addf %90, %92 : vector<8x128xf32>
    %c0_48 = arith.constant 0 : index
    %c0_49 = arith.constant 0 : index
    %c0_50 = arith.constant 0 : index
    %94 = vector.load %arg3[%c0_48, %c0_49, %c0_50] : memref<1x8x128xf32, #tpu.memory_space<vmem>>, vector<1x8x128xf32>
    %95 = vector.shape_cast %94 : vector<1x8x128xf32> to vector<8x128xf32>
    %c1_i32_51 = arith.constant 1 : i32
    %96 = tpu.dynamic_rotate %95 by %c1_i32_51 dim 1 : vector<8x128xf32>, i32 -> vector<8x128xf32>
    %cst_52 = arith.constant 0.000000e+00 : f32
    %97 = vector.shape_cast %4 : vector<1x128xi1> to vector<1x128xi1>
    %98 = vector.broadcast %97 : vector<1x128xi1> to vector<8x128xi1>
    %99 = vector.broadcast %cst_52 : f32 to vector<8x128xf32>
    %100 = arith.select %98, %96, %99 : vector<8x128xi1>, vector<8x128xf32>
    %c127_i32_53 = arith.constant 127 : i32
    %101 = tpu.dynamic_rotate %95 by %c127_i32_53 dim 1 : vector<8x128xf32>, i32 -> vector<8x128xf32>
    %cst_54 = arith.constant 0.000000e+00 : f32
    %102 = vector.shape_cast %6 : vector<1x128xi1> to vector<1x128xi1>
    %103 = vector.broadcast %102 : vector<1x128xi1> to vector<8x128xi1>
    %104 = vector.broadcast %cst_54 : f32 to vector<8x128xf32>
    %105 = arith.select %103, %101, %104 : vector<8x128xi1>, vector<8x128xf32>
    %c96 = arith.constant 96 : index
    %c0_55 = arith.constant 0 : index
    %106 = vector.load %arg4[%c96, %c0_55] : memref<168x16xf32, #tpu.memory_space<vmem>>, vector<8x8xf32>
    %cst_56 = arith.constant dense<0.000000e+00> : vector<8x128xf32>
    %107 = tpu.matmul %106, %100, %cst_56 {dimension_numbers = #tpu.dot_dimension_numbers<[1], [0], [0], [1], [0, 0, 1, 1], [], []>} : vector<8x8xf32>, vector<8x128xf32>, vector<8x128xf32> -> vector<8x128xf32>
    %c104 = arith.constant 104 : index
    %c0_57 = arith.constant 0 : index
    %108 = vector.load %arg4[%c104, %c0_57] : memref<168x16xf32, #tpu.memory_space<vmem>>, vector<8x8xf32>
    %cst_58 = arith.constant dense<0.000000e+00> : vector<8x128xf32>
    %109 = tpu.matmul %108, %95, %cst_58 {dimension_numbers = #tpu.dot_dimension_numbers<[1], [0], [0], [1], [0, 0, 1, 1], [], []>} : vector<8x8xf32>, vector<8x128xf32>, vector<8x128xf32> -> vector<8x128xf32>
    %110 = arith.addf %107, %109 : vector<8x128xf32>
    %c112 = arith.constant 112 : index
    %c0_59 = arith.constant 0 : index
    %111 = vector.load %arg4[%c112, %c0_59] : memref<168x16xf32, #tpu.memory_space<vmem>>, vector<8x8xf32>
    %cst_60 = arith.constant dense<0.000000e+00> : vector<8x128xf32>
    %112 = tpu.matmul %111, %105, %cst_60 {dimension_numbers = #tpu.dot_dimension_numbers<[1], [0], [0], [1], [0, 0, 1, 1], [], []>} : vector<8x8xf32>, vector<8x128xf32>, vector<8x128xf32> -> vector<8x128xf32>
    %113 = arith.addf %110, %112 : vector<8x128xf32>
    %114 = arith.addf %93, %113 : vector<8x128xf32>
    %c152 = arith.constant 152 : index
    %c0_61 = arith.constant 0 : index
    %115 = vector.load %arg4[%c152, %c0_61] : memref<168x16xf32, #tpu.memory_space<vmem>>, vector<8x1xf32>
    %116 = vector.broadcast %115 : vector<8x1xf32> to vector<8x128xf32>
    %117 = arith.addf %114, %116 : vector<8x128xf32>
    %cst_62 = arith.constant 0.000000e+00 : f32
    %118 = vector.broadcast %cst_62 : f32 to vector<8x128xf32>
    %119 = arith.maximumf %117, %118 : vector<8x128xf32>
    %c120 = arith.constant 120 : index
    %c0_63 = arith.constant 0 : index
    %120 = vector.load %arg4[%c120, %c0_63] : memref<168x16xf32, #tpu.memory_space<vmem>>, vector<8x8xf32>
    %cst_64 = arith.constant dense<0.000000e+00> : vector<8x128xf32>
    %121 = tpu.matmul %120, %119, %cst_64 {dimension_numbers = #tpu.dot_dimension_numbers<[1], [0], [0], [1], [0, 0, 1, 1], [], []>} : vector<8x8xf32>, vector<8x128xf32>, vector<8x128xf32> -> vector<8x128xf32>
    %c160 = arith.constant 160 : index
    %c0_65 = arith.constant 0 : index
    %122 = vector.load %arg4[%c160, %c0_65] : memref<168x16xf32, #tpu.memory_space<vmem>>, vector<8x1xf32>
    %123 = vector.broadcast %122 : vector<8x1xf32> to vector<8x128xf32>
    %124 = arith.addf %121, %123 : vector<8x128xf32>
    %c0_66 = arith.constant 0 : index
    %c0_67 = arith.constant 0 : index
    %c0_68 = arith.constant 0 : index
    %125 = vector.load %arg5[%c0_66, %c0_67, %c0_68] : memref<1x8x128xf32, #tpu.memory_space<vmem>>, vector<1x8x128xf32>
    %126 = vector.shape_cast %125 : vector<1x8x128xf32> to vector<8x128xf32>
    %127 = vector.shape_cast %124 : vector<8x128xf32> to vector<1x8x128xf32>
    tpu.vector_store %arg5[%c0_66, %c0_67, %c0_68], %127 {strides = array<i32>} : memref<1x8x128xf32, #tpu.memory_space<vmem>>, vector<1x8x128xf32>,
    return
  }
  func.func @transform_0(%arg0: i32) -> (i32, i32, i32) {
    %c0_i32 = arith.constant 0 : i32
    %c0_i32_0 = arith.constant 0 : i32
    %c0_i32_1 = arith.constant 0 : i32
    return %arg0, %c0_i32, %c0_i32_0 : i32, i32, i32
  }
  func.func @transform_1(%arg0: i32) -> (i32, i32, i32) {
    %c0_i32 = arith.constant 0 : i32
    %c0_i32_0 = arith.constant 0 : i32
    %c0_i32_1 = arith.constant 0 : i32
    return %arg0, %c0_i32, %c0_i32_0 : i32, i32, i32
  }
  func.func @transform_2(%arg0: i32) -> (i32, i32, i32) {
    %c0_i32 = arith.constant 0 : i32
    %c0_i32_0 = arith.constant 0 : i32
    %c0_i32_1 = arith.constant 0 : i32
    return %arg0, %c0_i32, %c0_i32_0 : i32, i32, i32
  }
  func.func @transform_3(%arg0: i32) -> (i32, i32) {
    %c0_i32 = arith.constant 0 : i32
    %c0_i32_0 = arith.constant 0 : i32
    %c0_i32_1 = arith.constant 0 : i32
    return %c0_i32, %c0_i32_0 : i32, i32
  }
  func.func @transform_4(%arg0: i32) -> (i32, i32, i32) {
    %c0_i32 = arith.constant 0 : i32
    %c0_i32_0 = arith.constant 0 : i32
    %c0_i32_1 = arith.constant 0 : i32
    return %arg0, %c0_i32, %c0_i32_0 : i32, i32, i32
  }
}

</mosaic_0001>

<bundles_post_ra>
// kernel: decoder_forward.1
= control target key start
LH: loop header
LB: loop body
LE: loop exit
PB: predicated region body
PF: predicated region fallthrough
CT: control target
= control target key end

     0   :  { %s1795_s15 = smov 0   ;;  %s1982_s0 = inlined_call_operand.vmem [shape: f32[2,16,128], index: 0, kind: input, shape index: {}]   ;;  %s1983_s1 = inlined_call_operand.vmem [shape: f32[2,8,128], index: 1, kind: input, shape index: {}]   ;;  %s1984_s2 = inlined_call_operand.vmem [shape: f32[2,8,128], index: 2, kind: input, shape index: {}]   ;;  %s1985_s3 = inlined_call_operand.vmem [shape: f32[168,16], index: 3, kind: input, shape index: {}]   ;;  %s1986_s4 = inlined_call_operand.vmem [shape: f32[2,8,128], index: 4, kind: output, shape index: {}]  }
   0x1 LB: > { %s1579_s16 = sadd.s32 4294967295, %s1762_s15   ;;  %p1583_p0 = scmp.ge.s32.totalorder %s1762_s15, 1  ;;  %s1762_s15 = sphi %s1795_s15, %s14_s15  }
   0x2   : > { %p180_p1 = scmp.lt.s32.totalorder %s1762_s15, 3 }
   0x4   : > { %p181_p2 = pnand %p1583_p0, %p180_p1 }
   0x5   : > { %p213_p3 = scmp.lt.s32.totalorder (!%p181_p2), %s1579_s16, 1  ;;  %v1764_v0 = vmov (!%p181_p2), 0.0|0.0   ;;  %v391_v1 = vld [vmem:[%s1985_s3 + $0x80] sm:$0xff] (!%p181_p2)  ;;  %vm1765_vm0 = vmmov (!%p181_p2), 0   ;;  %v1766_v2 = vmov (!%p181_p2), 0.0   ;;  %v1767_v3 = vmov (!%p181_p2), 0  }
   0x6   : > { %184 = sbr.rel (%p181_p2) target bundleno = 1360 (0x550), region = 36  ;;  %1734 = vmatprep.subr.bf16.mxu0 (!%p181_p2), %v1764_v0  ;;  %1737 = vmatprep.subr.bf16.mxu1 (!%p181_p2), %v1764_v0  ;;  %v239_v7 = vld [vmem:[%s1985_s3] sm:$0xff] (!%p181_p2)  ;;  %vm240_vm1 = vcmask (!%p181_p2), 130048   ;;  %v314_v8 = vld [vmem:[%s1985_s3 + $0x8] sm:$0xff] (!%p181_p2)  ;;  %v230_v9 = vlaneseq (!%p181_p2)  ;;  %v410_v20 = vld [vmem:[%s1985_s3 + $0x18] sm:$0xff] (!%p181_p2)  ;;  %vm411_vm3 = vcmask (!%p181_p2), 64512  }
   0x7   : > { %1654 = vmatprep.mubr.msk.f32.mxu0 (!%p181_p2), %vm1765_vm0, %v1766_v2  ;;  %1661 = vmatprep.mubr.msk.f32.mxu1 (!%p181_p2), %vm1765_vm0, %v1766_v2  ;;  %s1768_s7 = smov (!%p181_p2), 127   ;;  %s1769_s8 = smov (!%p181_p2), 1   ;;  %v873_v22 = vld [vmem:[%s1985_s3 + $0x90] sm:$0xff] (!%p181_p2)  ;;  %v864_v23 = vld [vmem:[%s1985_s3 + $0x88] sm:$0xff] (!%p181_p2)  ;;  %v558_v28 = vld [vmem:[%s1985_s3 + $0x20] sm:$0xff] (!%p181_p2) }
   0x8   : > { %1754 = vset.pattern.permute.xlu0 (!%p181_p2), %v1767_v3  ;;  %1755 = vset.pattern.permute.xlu1 (!%p181_p2), %v1767_v3  ;;  %v231_v10 = vand.u32 (!%p181_p2), 127, %v230_v9  ;;  %v409_v27 = vld [vmem:[%s1985_s3 + $0x10] sm:$0xff] (!%p181_p2)  ;;  %v640_v32 = vld [vmem:[%s1985_s3 + $0x28] sm:$0xff] (!%p181_p2)  ;;  %v788_v35 = vld [vmem:[%s1985_s3 + $0x38] sm:$0xff] (!%p181_p2) }
   0x9   : > { %394 = vperm.xlu0 (!%p181_p2), %1754, %v391_v1   ;;  %v641_v31 = vld [vmem:[%s1985_s3 + $0x30] sm:$0xff] (!%p181_p2)  ;;  %v872_v56 = vld [vmem:[%s1985_s3 + $0x40] sm:$0xff] (!%p181_p2)  ;;  %v1413_v1 = vld [vmem:[%s1985_s3 + $0x98] sm:$0xff] (!%p181_p2) }
   0xa   : > { %v235_v11 = vand.u32 (!%p181_p2), 1, %v231_v10  ;;  %v232_v24 = vand.u32 (!%p181_p2), 15, %v231_v10  ;;  %v960_v62 = vld [vmem:[%s1985_s3 + $0x50] sm:$0xff] (!%p181_p2)  ;;  %v1422_v0 = vld [vmem:[%s1985_s3 + $0xa0] sm:$0xff] (!%p181_p2)  ;;  %v959_v3 = vld [vmem:[%s1985_s3 + $0x48] sm:$0xff] (!%p181_p2) }
   0xc   : > { %vm236_vm2 = vcmp.eq.s32.totalorder (!%p181_p2), %v235_v11, 0  ;;  %vm1852_vm4 = vcmp.ne.s32.totalorder (!%p181_p2), %v232_v24, 0  ;;  %vm1856_vm5 = vcmp.ne.s32.totalorder (!%p181_p2), %v232_v24, 15  ;;  %v1337_v11 = vld [vmem:[%s1985_s3 + $0x70] sm:$0xff] (!%p181_p2) }
   0xd   : > { %s1992_s16 = smov (!%p213_p3, %s1579_s16), 1 }
   0xe   : > { %s1615_s19 = sshll.u32 %s1992_s16, 4  ;;  %s1829_s27 = sshll.u32 %s1992_s16, 3 }
   0xf   : > { %s217_s22 = scalar_lea.vmem %s1982_s0, %s1615_s19  ;;  %s221_s30 = scalar_lea.vmem %s1983_s1, %s1829_s27 }
  0x10   : > { %v237_v4 = vld [vmem:[%s217_s22] sm:$0xff]  ;;  %v238_v5 = vld [vmem:[%s217_s22 + $0x8] sm:$0xff]  ;;  %s225_s29 = scalar_lea.vmem %s1984_s2, %s1829_s27  ;;  %s229_s25 = scalar_lea.vmem %s1986_s4, %s1829_s27 }
  0x11   : > { %v1735_v6 = vpack.c.bf16 %v238_v5, %v237_v4  ;;  %v633_v21 = vld [vmem:[%s221_s30] sm:$0xff]  ;;  %v1107_v4 = vld [vmem:[%s1985_s3 + $0x58] sm:$0xff] }
  0x12   : > { %v1182_v63 = vld [vmem:[%s225_s29] sm:$0xff] }
  0x13   : > { %1736 = vmatpush3.bf16.msra.mxu0 %v1735_v6  ;;  %1739 = vmatpush3.bf16.msra.mxu1 %v1735_v6 }
  0x14   : > { %1664 = vmatprep.subr.mxu0 %v1766_v2  ;;  %1669 = vmatprep.subr.mxu1 %v1766_v2 }
  0x16   : > { %1655 = vmatmul.mubr.msk.f32.vlgmr.msra.gmra.mrb[0].mxu0 %vm240_vm1, %v239_v7  ;;  %1662 = vmatmul.mubr.msk.f32.vlgmr.msra.gmra.mrb[0].mxu1 %vm240_vm1, %v314_v8  ;;  %v1190_v7 = vld [vmem:[%s1985_s3 + $0x68] sm:$0xff]  ;;  %v1189_v8 = vld [vmem:[%s1985_s3 + $0x60] sm:$0xff] }
  0x17   : > { %1666 = vmatprep.mubr.msk.f32.mxu0 %vm1765_vm0, %v1766_v2  ;;  %1671 = vmatprep.mubr.msk.f32.mxu1 %vm1765_vm0, %v1766_v2 }
  0x88   : > { %v395_v12 = vpop.permute.xlu0 %394 }
  0xe9   : > { %v310_v13 = vpop.f32.mrb[0].mxu0  ;;  %v384_v14 = vpop.f32.mrb[0].mxu1 }
  0xea   : > { %v390_v15 = vsel %vm236_vm2, %v310_v13, %v384_v14  ;;  %v1656_v16 = vpop.f32.mrb[1].mxu0  ;;  %v1663_v17 = vpop.f32.mrb[1].mxu1 }
  0xeb   : > { %v397_v18 = vadd.f32 %v395_v12, %v390_v15 }
  0xed   : > { %v398_v19 = vmax.f32 %v397_v18, 0.0 }
  0xef   : > { %404 = vrot.lane.b32.xlu1 %v398_v19, %s1768_s7  ;;  %399 = vrot.lane.b32.xlu0 %v398_v19, %s1769_s8 }
  0xf0   : > { %1665 = vmatpush3.msra.mxu0 %v398_v19 }
  0xf1   : > { %1667 = vmatmul.mubr.msk.f32.vlgmr.msra.gmra.mrb[2].mxu0 %vm411_vm3, %v410_v20  ;;  %1674 = vmatprep.subr.mxu0 %v1766_v2 }
  0xf2   : > { %1676 = vmatprep.mubr.msk.f32.mxu0 %vm1765_vm0, %v1766_v2 }
  0xf3   : > { %634 = vrot.lane.b32.xlu1 %v633_v21, %s1769_s8  ;;  %637 = vrot.lane.b32.xlu0 %v633_v21, %s1768_s7 }
  0xf7   : > { %876 = vperm.xlu0 %1754, %v873_v22   ;;  %867 = vperm.xlu1 %1755, %v864_v23  }
 0x161   : > { %v405_v29 = vpop.permute.xlu1 %404  ;;  %v400_v30 = vpop.permute.xlu0 %399 }
 0x162   : > { %1670 = vmatpush3.msk.msra.mxu1 %vm1852_vm4, %v400_v30  ;;  %1675 = vmatpush3.msk.msra.mxu0 %vm1856_vm5, %v405_v29 }
 0x163   : > { %1672 = vmatmul.mubr.msk.f32.vlgmr.msra.gmra.mrb[2].mxu1 %vm411_vm3, %v409_v27  ;;  %1677 = vmatmul.mubr.msk.f32.vlgmr.msra.gmra.mrb[4].mxu0 %vm411_vm3, %v558_v28 }
 0x164   : > { %1679 = vmatprep.subr.mxu1 %v1766_v2  ;;  %1684 = vmatprep.subr.mxu0 %v1766_v2 }
 0x165   : > { %v635_v33 = vpop.permute.xlu1 %634  ;;  %1680 = vmatpush3.msra.mxu1 %v633_v21  ;;  %1681 = vmatprep.mubr.msk.f32.mxu1 %vm1765_vm0, %v1766_v2  ;;  %v638_v34 = vpop.permute.xlu0 %637 }
 0x166   : > { %1685 = vmatpush3.msk.msra.mxu0 %vm1852_vm4, %v635_v33  ;;  %1686 = vmatprep.mubr.msk.f32.mxu0 %vm1765_vm0, %v1766_v2 }
 0x167   : > { %1682 = vmatmul.mubr.msk.f32.vlgmr.msra.gmra.mrb[4].mxu1 %vm411_vm3, %v641_v31  ;;  %1687 = vmatmul.mubr.msk.f32.vlgmr.msra.gmra.mrb[6].mxu0 %vm411_vm3, %v640_v32  ;;  %v1421_v31 = vld [vmem:[%s1985_s3 + $0x78] sm:$0xff] }
 0x168   : > { %1689 = vmatprep.subr.mxu1 %v1766_v2  ;;  %1691 = vmatprep.mubr.msk.f32.mxu1 %vm1765_vm0, %v1766_v2 }
 0x169   : > { %1690 = vmatpush3.msk.msra.mxu1 %vm1856_vm5, %v638_v34  ;;  %1694 = vmatprep.subr.mxu0 %v1766_v2 }
 0x16a   : > { %1696 = vmatprep.mubr.msk.f32.mxu0 %vm1765_vm0, %v1766_v2  ;;  %1699 = vmatprep.subr.mxu1 %v1766_v2 }
 0x16b   : > { %1692 = vmatmul.mubr.msk.f32.vlgmr.msra.gmra.mrb[6].mxu1 %vm411_vm3, %v788_v35 }
 0x16c   : > { %1701 = vmatprep.mubr.msk.f32.mxu1 %vm1765_vm0, %v1766_v2 }
 0x176   : > { %v868_v52 = vpop.permute.xlu1 %867  ;;  %v877_v57 = vpop.permute.xlu0 %876 }
 0x1c4   : > { %v481_v36 = vpop.f32.mrb[2].mxu0 }
 0x1c5   : > { %v1668_v37 = vpop.f32.mrb[3].mxu0 }
 0x236   : > { %v554_v38 = vpop.f32.mrb[2].mxu1  ;;  %v628_v39 = vpop.f32.mrb[4].mxu0 }
 0x237   : > { %v555_v40 = vadd.f32 %v554_v38, %v481_v36  ;;  %v1673_v41 = vpop.f32.mrb[3].mxu1  ;;  %v1678_v42 = vpop.f32.mrb[5].mxu0 }
 0x239   : > { %v632_v43 = vadd.f32 %v628_v39, %v555_v40 }
 0x23a   : > { %v711_v44 = vpop.f32.mrb[4].mxu1  ;;  %v784_v45 = vpop.f32.mrb[6].mxu0 }
 0x23b   : > { %v785_v46 = vadd.f32 %v784_v45, %v711_v44  ;;  %v1683_v47 = vpop.f32.mrb[5].mxu1  ;;  %v1688_v48 = vpop.f32.mrb[7].mxu0 }
 0x23e   : > { %v858_v49 = vpop.f32.mrb[6].mxu1 }
 0x23f   : > { %v862_v50 = vadd.f32 %v858_v49, %v785_v46  ;;  %v1693_v51 = vpop.f32.mrb[7].mxu1 }
 0x241   : > { %v863_v53 = vadd.f32 %v862_v50, %v632_v43 }
 0x243   : > { %v870_v54 = vadd.f32 %v868_v52, %v863_v53 }
 0x245   : > { %v871_v55 = vmax.f32 %v870_v54, 0.0 }
 0x247   : > { %1695 = vmatpush3.msra.mxu0 %v871_v55 }
 0x248   : > { %1697 = vmatmul.mubr.msk.f32.vlgmr.msra.gmra.mrb[8].mxu0 %vm411_vm3, %v872_v56  ;;  %1704 = vmatprep.subr.mxu0 %v1766_v2 }
 0x249   : > { %1706 = vmatprep.mubr.msk.f32.mxu0 %vm1765_vm0, %v1766_v2 }
 0x31b   : > { %v948_v58 = vpop.f32.mrb[8].mxu0 }
 0x31c   : > { %v949_v59 = vadd.f32 %v948_v58, %v877_v57  ;;  %v1698_v60 = vpop.f32.mrb[9].mxu0 }
 0x31e   : > { %v952_v61 = vmax.f32 %v949_v59, 0.0 }
 0x320   : > { %956 = vrot.lane.b32.xlu0 %v952_v61, %s1768_s7  ;;  %953 = vrot.lane.b32.xlu1 %v952_v61, %s1769_s8 }
 0x321   : > { %1700 = vmatpush3.msra.mxu1 %v952_v61 }
 0x322   : > { %1702 = vmatmul.mubr.msk.f32.vlgmr.msra.gmra.mrb[8].mxu1 %vm411_vm3, %v960_v62  ;;  %1709 = vmatprep.subr.mxu1 %v1766_v2 }
 0x323   : > { %1711 = vmatprep.mubr.msk.f32.mxu1 %vm1765_vm0, %v1766_v2 }
 0x324   : > { %1186 = vrot.lane.b32.xlu0 %v1182_v63, %s1768_s7  ;;  %1183 = vrot.lane.b32.xlu1 %v1182_v63, %s1769_s8 }
 0x328   : > { %1425 = vperm.xlu0 %1754, %v1422_v0   ;;  %1416 = vperm.xlu1 %1755, %v1413_v1  }
 0x392   : > { %v957_v5 = vpop.permute.xlu0 %956  ;;  %v954_v6 = vpop.permute.xlu1 %953 }
 0x393   : > { %1705 = vmatpush3.msk.msra.mxu0 %vm1852_vm4, %v954_v6  ;;  %1710 = vmatpush3.msk.msra.mxu1 %vm1856_vm5, %v957_v5 }
 0x394   : > { %1707 = vmatmul.mubr.msk.f32.vlgmr.msra.gmra.mrb[10].mxu0 %vm411_vm3, %v959_v3  ;;  %1712 = vmatmul.mubr.msk.f32.vlgmr.msra.gmra.mrb[10].mxu1 %vm411_vm3, %v1107_v4 }
 0x395   : > { %1714 = vmatprep.subr.mxu0 %v1766_v2  ;;  %1719 = vmatprep.subr.mxu1 %v1766_v2 }
 0x396   : > { %v1184_v9 = vpop.permute.xlu1 %1183  ;;  %1715 = vmatpush3.msra.mxu0 %v1182_v63  ;;  %1716 = vmatprep.mubr.msk.f32.mxu0 %vm1765_vm0, %v1766_v2  ;;  %v1187_v10 = vpop.permute.xlu0 %1186 }
 0x397   : > { %1720 = vmatpush3.msk.msra.mxu1 %vm1852_vm4, %v1184_v9  ;;  %1721 = vmatprep.mubr.msk.f32.mxu1 %vm1765_vm0, %v1766_v2 }
 0x398   : > { %1717 = vmatmul.mubr.msk.f32.vlgmr.msra.gmra.mrb[12].mxu0 %vm411_vm3, %v1190_v7  ;;  %1722 = vmatmul.mubr.msk.f32.vlgmr.msra.gmra.mrb[12].mxu1 %vm411_vm3, %v1189_v8 }
 0x399   : > { %1724 = vmatprep.subr.mxu0 %v1766_v2  ;;  %1726 = vmatprep.mubr.msk.f32.mxu0 %vm1765_vm0, %v1766_v2 }
 0x39a   : > { %1725 = vmatpush3.msk.msra.mxu0 %vm1856_vm5, %v1187_v10  ;;  %1729 = vmatprep.subr.mxu1 %v1766_v2 }
 0x39b   : > { %1731 = vmatprep.mubr.msk.f32.mxu1 %vm1765_vm0, %v1766_v2 }
 0x39c   : > { %1727 = vmatmul.mubr.msk.f32.vlgmr.msra.gmra.mrb[14].mxu0 %vm411_vm3, %v1337_v11 }
 0x3a7   : > { %v1417_v28 = vpop.permute.xlu1 %1416  ;;  %v1426_v32 = vpop.permute.xlu0 %1425 }
 0x3f5   : > { %v1030_v12 = vpop.f32.mrb[8].mxu1 }
 0x3f6   : > { %v1703_v13 = vpop.f32.mrb[9].mxu1 }
 0x467   : > { %v1103_v14 = vpop.f32.mrb[10].mxu0  ;;  %v1177_v15 = vpop.f32.mrb[10].mxu1 }
 0x468   : > { %v1104_v16 = vadd.f32 %v1103_v14, %v1030_v12  ;;  %v1708_v17 = vpop.f32.mrb[11].mxu0  ;;  %v1713_v18 = vpop.f32.mrb[11].mxu1 }
 0x46a   : > { %v1181_v19 = vadd.f32 %v1177_v15, %v1104_v16 }
 0x46b   : > { %v1260_v20 = vpop.f32.mrb[12].mxu0  ;;  %v1333_v21 = vpop.f32.mrb[12].mxu1 }
 0x46c   : > { %v1334_v22 = vadd.f32 %v1333_v21, %v1260_v20  ;;  %v1718_v23 = vpop.f32.mrb[13].mxu0  ;;  %v1723_v24 = vpop.f32.mrb[13].mxu1 }
 0x46f   : > { %v1407_v25 = vpop.f32.mrb[14].mxu0 }
 0x470   : > { %v1411_v26 = vadd.f32 %v1407_v25, %v1334_v22  ;;  %v1728_v27 = vpop.f32.mrb[15].mxu0 }
 0x472   : > { %v1412_v2 = vadd.f32 %v1411_v26, %v1181_v19 }
 0x474   : > { %v1419_v29 = vadd.f32 %v1417_v28, %v1412_v2 }
 0x476   : > { %v1420_v30 = vmax.f32 %v1419_v29, 0.0 }
 0x478   : > { %1730 = vmatpush3.msra.mxu1 %v1420_v30 }
 0x479   : > { %1732 = vmatmul.mubr.msk.f32.vlgmr.msra.gmra.mrb[14].mxu1 %vm411_vm3, %v1421_v31 }
 0x54c   : > { %v1497_v33 = vpop.f32.mrb[14].mxu1 }
 0x54d   : > { %v1498_v34 = vadd.f32 %v1497_v33, %v1426_v32  ;;  %v1733_v35 = vpop.f32.mrb[15].mxu1 }
 0x54f   : > { %1501 = vst [vmem:[%s229_s25] sm:$0xff] %v1498_v34 }
 0x550 PF: > { %s14_s15 = sadd.s32 1, %s1762_s15  }
 0x551   : > { %p11_p4 = scmp.ge.s32.totalorder %s14_s15, 4  }
 0x553   :  { %13 = sbr.rel (!%p11_p4) target bundleno = 1 (0x1), region = 72 }

</bundles_post_ra>
